<compile_context>
chip_gen: v6e
topology: v6e:2x2x1
jax: 0.10.0
libtpu: 0.0.40
codegen_flags: <defaults>
</compile_context>

<pallas_src>
import functools

import jax
import jax.numpy as jnp
from jax.experimental import pallas as pl
from jax.experimental.pallas import tpu as pltpu


# --------------------------------------------------------------------------- #
# Kernels
# --------------------------------------------------------------------------- #
def _masked_bce_tile(pred_ref, real_ref, mask_ref, shift_real):
    """Shared per-tile math: returns (p, y, mask_bool, total, count)."""
    p = pred_ref[...].astype(jnp.float32)
    # Fused [:, 1:] shift, done as a ref-window load (no full (TM,T) value).
    y = (real_ref[:, 1:] if shift_real else real_ref[...]).astype(jnp.float32)

    mraw = mask_ref[...]
    mbool = mraw if mraw.dtype == jnp.bool_ else (mraw != 0)

    # Binary-label BCE with a single log per element (EUP) and PyTorch-style
    # clamp at -100 so masked-out / padded zeros never produce NaN/Inf.
    # NOTE: exact only for y in {0, 1} (soft labels would need the 2-log form).
    sel = jnp.where(y > 0.5, p, 1.0 - p)
    bce = -jnp.maximum(jnp.log(sel), -100.0)

    total = jnp.sum(jnp.where(mbool, bce, 0.0))
    count = jnp.sum(jnp.where(mbool, 1.0, 0.0))
    return p, y, mbool, total, count


def _kt_loss_kernel(shift_real, pred_ref, real_ref, mask_ref,
                    ypred_ref, ytrue_ref, tot_ref, cnt_ref):
    p, y, mbool, total, count = _masked_bce_tile(pred_ref, real_ref, mask_ref,
                                                 shift_real)
    ypred_ref[...] = jnp.where(mbool, p, 0.0).astype(ypred_ref.dtype)
    ytrue_ref[...] = jnp.where(mbool, y, 0.0).astype(ytrue_ref.dtype)
    # Per-tile partial sums in one lane-dense (1, 8, 128) block each; the
    # wrapper reduces over the leading tile axis and divides.  Keeping the
    # grid axis "parallel" (no cross-tile accumulator) lets v7x use both TCs.
    tot_ref[...] = jnp.full(tot_ref.shape, total, dtype=jnp.float32)
    cnt_ref[...] = jnp.full(cnt_ref.shape, count, dtype=jnp.float32)


def _kt_loss_only_kernel(shift_real, pred_ref, real_ref, mask_ref,
                         tot_ref, cnt_ref):
    _, _, _, total, count = _masked_bce_tile(pred_ref, real_ref, mask_ref,
                                             shift_real)
    tot_ref[...] = jnp.full(tot_ref.shape, total, dtype=jnp.float32)
    cnt_ref[...] = jnp.full(cnt_ref.shape, count, dtype=jnp.float32)


# --------------------------------------------------------------------------- #
# Wrapper
# --------------------------------------------------------------------------- #
def _vmem_limit_bytes():
    """Generation-aware scoped-VMEM request.

    ~3/4 of physical per-core VMEM, clamped to [32, 64] MiB:
      v7x (64 MiB/TC)   -> 48 MiB
      v5e/v6e (128 MiB) -> 64 MiB
    """
    cap = 64 * 1024 * 1024
    try:
        info = pltpu.get_tpu_info()
        cap = int(getattr(info, "vmem_capacity_bytes", cap))
    except Exception:
        pass
    return int(max(32 * 1024 * 1024, min(64 * 1024 * 1024, (cap * 3) // 4)))


def _round_up(x, m):
    return ((x + m - 1) // m) * m


def kt_loss(pred_answers, real_answers, mask_seq, *, return_masked=True,
            y_pred_dtype=None, y_true_dtype=None):
    """JAX wrapper reproducing KTLoss.forward.

    pred_answers: [B, L] float probabilities (native dtype: f32 or bf16)
    real_answers: [B, L+1] labels (first column dropped in-kernel) or
                  [B, L] pre-shifted labels (skips the in-kernel lane shift)
    mask_seq:     [B, L] bool / integer 0-1 (passed through untouched; no
                  wrapper-side casts -- producers should emit narrow dtypes)

    Returns (loss, y_pred_masked [B,L], y_true_masked [B,L]) with zeros at
    unmasked positions, or just `loss` when return_masked=False (skips the
    two [B,L] output writes).  Output dtypes default to the input dtypes and
    can be narrowed via y_pred_dtype / y_true_dtype (e.g. int8 labels).
    """
    pred = pred_answers                       # no wrapper casts / copies
    real = real_answers
    mask = mask_seq                           # bool DMA'd as-is (1 byte/elem)

    B, L = pred.shape
    T = real.shape[1]
    if T == L + 1:
        shift_real = True                     # fuse the [:, 1:] shift in-kernel
    elif T == L:
        shift_real = False                    # caller pre-shifted upstream
    else:
        raise ValueError("real_answers must have L or L+1 timesteps")
    assert mask.shape == (B, L)

    y_pred_dtype = jnp.dtype(pred.dtype if y_pred_dtype is None else y_pred_dtype)
    y_true_dtype = jnp.dtype(real.dtype if y_true_dtype is None else y_true_dtype)

    # ---------------- tile-size derivation (actual dtypes, actual VMEM) ----
    vmem_limit = _vmem_limit_bytes()
    in_row = 2 * (pred.dtype.itemsize * L          # double-buffered inputs
                  + real.dtype.itemsize * T
                  + mask.dtype.itemsize * L)
    out_row = (2 * (y_pred_dtype.itemsize + y_true_dtype.itemsize) * L
               if return_masked else 0)            # double-buffered outputs
    tmp_row = 4 * 4 * L                            # ~4 live f32 [TM,L] temporaries
    bytes_per_row = max(1, in_row + out_row + tmp_row)
    budget = vmem_limit // 2                       # leave headroom for scratch
    tm_cap = max(32, min(2048, ((budget // bytes_per_row) // 32) * 32))

    if B < 64:
        # Too small to split usefully: one tile whose block == full array dims
        # (always layout-legal, no padding).
        TM, B_pad, num_tiles = B, B, 1
    else:
        # At least 2 balanced tiles so the "parallel" axis can be sharded
        # across both v7x TensorCores; more tiles only when B exceeds tm_cap.
        desired_tiles = max(2, -(-B // tm_cap))
        TM = min(tm_cap, _round_up(-(-B // desired_tiles), 32))
        B_pad = _round_up(B, TM)
        num_tiles = B_pad // TM
        if B_pad != B:
            # TODO(synk): batch zero-pad materializes a copy; bounded by < one
            # tile of rows, and padded rows are masked out (bce == 0).
            pad = B_pad - B
            pred = jnp.pad(pred, ((0, pad), (0, 0)))
            real = jnp.pad(real, ((0, pad), (0, 0)))
            mask = jnp.pad(mask, ((0, pad), (0, 0)))

    # ---------------- specs ------------------------------------------------
    pred_spec = pl.BlockSpec((TM, L), lambda i: (i, 0))
    real_spec = pl.BlockSpec((TM, T), lambda i: (i, 0))
    mask_spec = pl.BlockSpec((TM, L), lambda i: (i, 0))
    part_spec = pl.BlockSpec((1, 8, 128), lambda i: (i, 0, 0))
    part_shape = jax.ShapeDtypeStruct((num_tiles, 8, 128), jnp.float32)

    bytes_in = (pred.size * pred.dtype.itemsize
                + real.size * real.dtype.itemsize
                + mask.size * mask.dtype.itemsize)
    part_bytes = 2 * num_tiles * 8 * 128 * 4

    compiler_params = pltpu.CompilerParams(
        dimension_semantics=("parallel",),         # megacore-shardable on v7x
        vmem_limit_bytes=vmem_limit,
    )

    if return_masked:
        out_bytes = (B_pad * L) * (y_pred_dtype.itemsize + y_true_dtype.itemsize)
        cost = pl.CostEstimate(flops=8 * B_pad * L,
                               transcendentals=B_pad * L,
                               bytes_accessed=int(bytes_in + out_bytes + part_bytes))
        y_pred, y_true, tot, cnt = pl.pallas_call(
            functools.partial(_kt_loss_kernel, shift_real),
            out_shape=(
                jax.ShapeDtypeStruct((B_pad, L), y_pred_dtype),
                jax.ShapeDtypeStruct((B_pad, L), y_true_dtype),
                part_shape,
                part_shape,
            ),
            grid=(num_tiles,),
            in_specs=[pred_spec, real_spec, mask_spec],
            out_specs=(pred_spec, pred_spec, part_spec, part_spec),
            compiler_params=compiler_params,
            cost_estimate=cost,
        )(pred, real, mask)

        total = jnp.sum(tot[:, 0, 0])
        count = jnp.sum(cnt[:, 0, 0])
        # count == 0 -> NaN, matching torch BCELoss on an empty selection.
        loss = total / count
        return loss, y_pred[:B], y_true[:B]
    else:
        cost = pl.CostEstimate(flops=8 * B_pad * L,
                               transcendentals=B_pad * L,
                               bytes_accessed=int(bytes_in + part_bytes))
        tot, cnt = pl.pallas_call(
            functools.partial(_kt_loss_only_kernel, shift_real),
            out_shape=(part_shape, part_shape),
            grid=(num_tiles,),
            in_specs=[pred_spec, real_spec, mask_spec],
            out_specs=(part_spec, part_spec),
            compiler_params=compiler_params,
            cost_estimate=cost,
        )(pred, real, mask)
        return jnp.sum(tot[:, 0, 0]) / jnp.sum(cnt[:, 0, 0])


# --------------------------------------------------------------------------- #
# Self-test
# --------------------------------------------------------------------------- #
if __name__ == "__main__":
    key = jax.random.PRNGKey(0)
    k1, k2, k3, k4, k5, k6 = jax.random.split(key, 6)

    def ref_bce(pred_f32, real_shifted, m_f32):
        bce = -(real_shifted * jnp.maximum(jnp.log(pred_f32), -100.0)
                + (1.0 - real_shifted) * jnp.maximum(jnp.log(1.0 - pred_f32), -100.0))
        return jnp.sum(bce * m_f32) / jnp.sum(m_f32)

    # ---- Test 1: tiny shapes matching the module spec (all f32) -----------
    B, T = 2, 8
    L = T - 1
    pred_answers = jax.random.uniform(k1, (B, L), minval=0.05, maxval=0.95)
    real_answers = jax.random.bernoulli(k2, 0.5, (B, T)).astype(jnp.float32)
    mask_seq = jax.random.bernoulli(k3, 0.7, (B, L))
    mask_seq = mask_seq.at[0, 0].set(True)

    loss, y_pred, y_true = kt_loss(pred_answers, real_answers, mask_seq)
    loss_only = kt_loss(pred_answers, real_answers, mask_seq, return_masked=False)
    jax.block_until_ready((loss, y_pred, y_true, loss_only))

    real_s = real_answers[:, 1:]
    m = mask_seq.astype(jnp.float32)
    ref_loss = ref_bce(pred_answers, real_s, m)
    assert jnp.allclose(loss, ref_loss, rtol=1e-5, atol=1e-6), (loss, ref_loss)
    assert jnp.allclose(loss_only, ref_loss, rtol=1e-5, atol=1e-6), (loss_only, ref_loss)
    assert jnp.allclose(y_pred, pred_answers * m, atol=1e-6)
    assert jnp.allclose(y_true, real_s * m, atol=1e-6)

    # ---- Test 2: tiled / narrow-dtype path (bf16 pred, bool mask, int8
    #      y_true, 2 batch tiles so the parallel axis spans both v7x TCs) ----
    B2, T2 = 128, 34
    L2 = T2 - 1
    pred2 = jax.random.uniform(k4, (B2, L2), minval=0.05, maxval=0.95).astype(jnp.bfloat16)
    real2 = jax.random.bernoulli(k5, 0.5, (B2, T2)).astype(jnp.float32)
    mask2 = jax.random.bernoulli(k6, 0.8, (B2, L2))
    mask2 = mask2.at[0, 0].set(True)

    loss2, y_pred2, y_true2 = kt_loss(pred2, real2, mask2, y_true_dtype=jnp.int8)
    # Pre-shifted [B, L] labels exercise the shift_real=False fast path.
    loss2b = kt_loss(pred2, real2[:, 1:], mask2, return_masked=False)
    jax.block_until_ready((loss2, y_pred2, y_true2, loss2b))

    p2 = pred2.astype(jnp.float32)
    r2 = real2[:, 1:]
    m2 = mask2.astype(jnp.float32)
    ref2 = ref_bce(p2, r2, m2)
    assert jnp.allclose(loss2, ref2, rtol=1e-4, atol=1e-5), (loss2, ref2)
    assert jnp.allclose(loss2b, ref2, rtol=1e-4, atol=1e-5), (loss2b, ref2)
    assert jnp.allclose(y_pred2.astype(jnp.float32), p2 * m2, atol=1e-6)
    assert jnp.allclose(y_true2.astype(jnp.float32), r2 * m2, atol=1e-6)

    print("KERNEL_OK")
</pallas_src>

<mosaic_0001>
module attributes {stable_mosaic.version = 11 : i64} {
  func.func @_kt_loss_kernel(%arg0: i32, %arg1: memref<2x7xf32, #tpu.memory_space<vmem>>, %arg2: memref<2x8xf32, #tpu.memory_space<vmem>>, %arg3: memref<2x7xi32, #tpu.memory_space<vmem>>, %arg4: memref<2x7xf32, #tpu.memory_space<vmem>>, %arg5: memref<2x7xf32, #tpu.memory_space<vmem>>, %arg6: memref<1x8x128xf32, #tpu.memory_space<vmem>>, %arg7: memref<1x8x128xf32, #tpu.memory_space<vmem>>) attributes {dimension_semantics = [#tpu.dimension_semantics<parallel>], iteration_bounds = array<i64: 1>, scalar_prefetch = 0 : i64, scratch_operands = 0 : i64, tpu.core_type = #tpu.core_type<tc>, window_params = [{transform_indices = @transform_0, window_bounds = array<i64: 2, 7>}, {transform_indices = @transform_1, window_bounds = array<i64: 2, 8>}, {transform_indices = @transform_2, window_bounds = array<i64: 2, 7>}, {transform_indices = @transform_3, window_bounds = array<i64: 2, 7>}, {transform_indices = @transform_4, window_bounds = array<i64: 2, 7>}, {transform_indices = @transform_5, window_bounds = array<i64: 1, 8, 128>}, {transform_indices = @transform_6, window_bounds = array<i64: 1, 8, 128>}]} {
    %c0 = arith.constant 0 : index
    %c0_0 = arith.constant 0 : index
    %0 = vector.load %arg1[%c0, %c0_0] : memref<2x7xf32, #tpu.memory_space<vmem>>, vector<2x7xf32>
    %c0_1 = arith.constant 0 : index
    %c1 = arith.constant 1 : index
    %1 = vector.load %arg2[%c0_1, %c1] : memref<2x8xf32, #tpu.memory_space<vmem>>, vector<2x7xf32>
    %c0_2 = arith.constant 0 : index
    %c0_3 = arith.constant 0 : index
    %2 = vector.load %arg3[%c0_2, %c0_3] : memref<2x7xi32, #tpu.memory_space<vmem>>, vector<2x7xi32>
    %cst = arith.constant dense<0> : vector<2x7xi32>
    %3 = arith.cmpi ne, %2, %cst : vector<2x7xi32>
    %cst_4 = arith.constant 5.000000e-01 : f32
    %4 = vector.broadcast %cst_4 : f32 to vector<2x7xf32>
    %5 = arith.cmpf ogt, %1, %4 : vector<2x7xf32>
    %cst_5 = arith.constant 1.000000e+00 : f32
    %6 = vector.broadcast %cst_5 : f32 to vector<2x7xf32>
    %7 = arith.subf %6, %0 : vector<2x7xf32>
    %8 = arith.select %5, %0, %7 : vector<2x7xi1>, vector<2x7xf32>
    %9 = math.log %8 : vector<2x7xf32>
    %cst_6 = arith.constant -1.000000e+02 : f32
    %10 = vector.broadcast %cst_6 : f32 to vector<2x7xf32>
    %11 = arith.maximumf %9, %10 : vector<2x7xf32>
    %cst_7 = arith.constant 0.000000e+00 : f32
    %12 = vector.broadcast %cst_7 : f32 to vector<2x7xf32>
    %13 = arith.subf %12, %11 : vector<2x7xf32>
    %cst_8 = arith.constant 0.000000e+00 : f32
    %14 = vector.broadcast %cst_8 : f32 to vector<2x7xf32>
    %15 = arith.select %3, %13, %14 : vector<2x7xi1>, vector<2x7xf32>
    %16 = vector.shape_cast %15 : vector<2x7xf32> to vector<1x2x7xf32>
    %cst_9 = arith.constant dense<0.000000e+00> : vector<1xf32>
    %17 = vector.multi_reduction <add>, %16, %cst_9 [1, 2] : vector<1x2x7xf32> to vector<1xf32>
    %18 = vector.shape_cast %17 : vector<1xf32> to vector<1x1x1xf32>
    %19 = vector.extract %18[0, 0, 0] : f32 from vector<1x1x1xf32>
    %cst_10 = arith.constant 1.000000e+00 : f32
    %cst_11 = arith.constant 0.000000e+00 : f32
    %20 = vector.broadcast %cst_10 : f32 to vector<2x7xf32>
    %21 = vector.broadcast %cst_11 : f32 to vector<2x7xf32>
    %22 = arith.select %3, %20, %21 : vector<2x7xi1>, vector<2x7xf32>
    %23 = vector.shape_cast %22 : vector<2x7xf32> to vector<1x2x7xf32>
    %cst_12 = arith.constant dense<0.000000e+00> : vector<1xf32>
    %24 = vector.multi_reduction <add>, %23, %cst_12 [1, 2] : vector<1x2x7xf32> to vector<1xf32>
    %25 = vector.shape_cast %24 : vector<1xf32> to vector<1x1x1xf32>
    %26 = vector.extract %25[0, 0, 0] : f32 from vector<1x1x1xf32>
    %cst_13 = arith.constant 0.000000e+00 : f32
    %27 = vector.broadcast %cst_13 : f32 to vector<2x7xf32>
    %28 = arith.select %3, %0, %27 : vector<2x7xi1>, vector<2x7xf32>
    %c0_14 = arith.constant 0 : index
    %c0_15 = arith.constant 0 : index
    %29 = vector.load %arg4[%c0_14, %c0_15] : memref<2x7xf32, #tpu.memory_space<vmem>>, vector<2x7xf32>
    tpu.vector_store %arg4[%c0_14, %c0_15], %28 {strides = array<i32>} : memref<2x7xf32, #tpu.memory_space<vmem>>, vector<2x7xf32>,
    %cst_16 = arith.constant 0.000000e+00 : f32
    %30 = vector.broadcast %cst_16 : f32 to vector<2x7xf32>
    %31 = arith.select %3, %1, %30 : vector<2x7xi1>, vector<2x7xf32>
    %c0_17 = arith.constant 0 : index
    %c0_18 = arith.constant 0 : index
    %32 = vector.load %arg5[%c0_17, %c0_18] : memref<2x7xf32, #tpu.memory_space<vmem>>, vector<2x7xf32>
    tpu.vector_store %arg5[%c0_17, %c0_18], %31 {strides = array<i32>} : memref<2x7xf32, #tpu.memory_space<vmem>>, vector<2x7xf32>,
    %33 = vector.broadcast %19 : f32 to vector<1x8x128xf32>
    %c0_19 = arith.constant 0 : index
    %c0_20 = arith.constant 0 : index
    %c0_21 = arith.constant 0 : index
    %34 = vector.load %arg6[%c0_19, %c0_20, %c0_21] : memref<1x8x128xf32, #tpu.memory_space<vmem>>, vector<1x8x128xf32>
    tpu.vector_store %arg6[%c0_19, %c0_20, %c0_21], %33 {strides = array<i32>} : memref<1x8x128xf32, #tpu.memory_space<vmem>>, vector<1x8x128xf32>,
    %35 = vector.broadcast %26 : f32 to vector<1x8x128xf32>
    %c0_22 = arith.constant 0 : index
    %c0_23 = arith.constant 0 : index
    %c0_24 = arith.constant 0 : index
    %36 = vector.load %arg7[%c0_22, %c0_23, %c0_24] : memref<1x8x128xf32, #tpu.memory_space<vmem>>, vector<1x8x128xf32>
    tpu.vector_store %arg7[%c0_22, %c0_23, %c0_24], %35 {strides = array<i32>} : memref<1x8x128xf32, #tpu.memory_space<vmem>>, vector<1x8x128xf32>,
    return
  }
  func.func @transform_0(%arg0: i32) -> (i32, i32) {
    %c0_i32 = arith.constant 0 : i32
    %c0_i32_0 = arith.constant 0 : i32
    return %arg0, %c0_i32 : i32, i32
  }
  func.func @transform_1(%arg0: i32) -> (i32, i32) {
    %c0_i32 = arith.constant 0 : i32
    %c0_i32_0 = arith.constant 0 : i32
    return %arg0, %c0_i32 : i32, i32
  }
  func.func @transform_2(%arg0: i32) -> (i32, i32) {
    %c0_i32 = arith.constant 0 : i32
    %c0_i32_0 = arith.constant 0 : i32
    return %arg0, %c0_i32 : i32, i32
  }
  func.func @transform_3(%arg0: i32) -> (i32, i32) {
    %c0_i32 = arith.constant 0 : i32
    %c0_i32_0 = arith.constant 0 : i32
    return %arg0, %c0_i32 : i32, i32
  }
  func.func @transform_4(%arg0: i32) -> (i32, i32) {
    %c0_i32 = arith.constant 0 : i32
    %c0_i32_0 = arith.constant 0 : i32
    return %arg0, %c0_i32 : i32, i32
  }
  func.func @transform_5(%arg0: i32) -> (i32, i32, i32) {
    %c0_i32 = arith.constant 0 : i32
    %c0_i32_0 = arith.constant 0 : i32
    %c0_i32_1 = arith.constant 0 : i32
    return %arg0, %c0_i32, %c0_i32_0 : i32, i32, i32
  }
  func.func @transform_6(%arg0: i32) -> (i32, i32, i32) {
    %c0_i32 = arith.constant 0 : i32
    %c0_i32_0 = arith.constant 0 : i32
    %c0_i32_1 = arith.constant 0 : i32
    return %arg0, %c0_i32, %c0_i32_0 : i32, i32, i32
  }
}

</mosaic_0001>

<bundles_post_ra>
// kernel: tpu_custom_call.1
= control target key start
LH: loop header
LB: loop body
LE: loop exit
PB: predicated region body
PF: predicated region fallthrough
CT: control target
= control target key end

     0   :  { %12 = vsyncpa [#allocation3], 0  ;;  %s304_s0 = inlined_call_operand.vmem [shape: f32[2,7], index: 0, kind: input, shape index: {}]   ;;  %s305_s1 = inlined_call_operand.vmem [shape: f32[2,8], index: 1, kind: input, shape index: {}]   ;;  %s306_s2 = inlined_call_operand.vmem [shape: s32[2,7], index: 2, kind: input, shape index: {}]   ;;  %s307_s3 = inlined_call_operand.hbm [shape: f32[2,7], index: 3, kind: output, shape index: {0}]   ;;  %s308_s4 = inlined_call_operand.hbm [shape: f32[2,7], index: 4, kind: output, shape index: {1}]   ;;  %s309_s5 = inlined_call_operand.hbm [shape: f32[1,8,128], index: 5, kind: output, shape index: {2}]   ;;  %s310_s6 = inlined_call_operand.hbm [shape: f32[1,8,128], index: 6, kind: output, shape index: {3}]  }
   0x1   :  { %13 = vsyncpa [#allocation5], 0  ;;  %v21_v0 = vld [vmem:[%s304_s0] sm:$0x3]  ;;  %s233_s23 = smov 1  }
   0x2   :  { %28 = vrot.lane.b32.xlu0 %v21_v0, %s233_s23  ;;  %v26_v1 = vsub.f32 1.0, %v21_v0 }
   0x3   :  { %14 = vsyncpa [#allocation8], 0  ;;  %v23_v2 = vld [vmem:[%s306_s2] sm:$0x3]  ;;  %vm45_vm1 = vcmask 50176   ;;  %v234_v3 = vmov 0.0  }
   0x4   :  { %vm24_vm0 = vcmp.ne.s32.totalorder %v23_v2, 0  ;;  %v22_v6 = vld [vmem:[%s305_s1] sm:$0x3]  ;;  %s235_s0 = smov 127   ;;  %s236_s1 = smov [#allocation4]  }
   0x5   :  { %v56_v4 = vsel %vm24_vm0, 1.0, %v234_v3  ;;  %vm25_vm2 = vcmp.gt.f32.partialorder %v22_v6, 0.5  ;;  %s95_s2 = sshll.u32 %s236_s1, 4  ;;  %v67_v20 = vsel %vm24_vm0, %v21_v0, 0.0  ;;  %s237_s28 = smov [#allocation2]   ;;  %s96_s2 = int_to_ptr.vmem [resolvable:$true] %s95_s2 }
   0x6   :  { %32 = vrot.lane.b32.xlu0 %v26_v1, %s233_s23  ;;  %v57_v5 = vsel %vm45_vm1, %v56_v4, 0.0  ;;  %s85_s29 = sshll.u32 %s237_s28, 4  ;;  %s147_s30 = scalar_lea.vmem %s96_s2, 32  ;;  %s86_s29 = int_to_ptr.vmem [resolvable:$true] %s85_s29 }
   0x7   :  { %p148_p0 = scmp.ne.s32.totalorder %s96_s2, %s147_s30  ;;  %p152_p1 = scmp.lt.s32.totalorder %s96_s2, %s96_s2 }
   0x8   :  { %p153_p2 = scmp.lt.s32.totalorder %s147_s30, %s147_s30 }
   0xa   :  { %p154_p3 = por %p153_p2, %p152_p1 }
   0xc   :  { %p155_p4 = pnand %p154_p3, %p148_p0 }
  0x25   :  { %58 = vadd.xlane.f32.xlu0 %v57_v5 }
  0x3b   :  { %70 = vrot.lane.b32.xlu0 %v22_v6, %s235_s0 }
  0x74   :  { %v29_v7 = vpop.permute.xlu0 %28 }
  0x78   :  { %v33_v8 = vpop.permute.xlu0 %32 }
  0x79   :  { %v35_v9 = vsel %vm25_vm2, %v29_v7, %v33_v8 }
  0x7a   :  { %145 = vlog2.f32 %v35_v9 }
  0x87   :  { %v146_v10 = vpop.eup %145 }
  0x88   :  { %v37_v11 = vmul.f32 0.6931472, %v146_v10 }
  0x8a   :  { %v38_v12 = vmax.f32 %v37_v11, -100.0 }
  0x8c   :  { %v39_v13 = vsub.f32 0.0, %v38_v12 }
  0x8e   :  { %41 = vrot.lane.b32.xlu1 %v39_v13, %s235_s0 }
  0xae   :  { %v59_v17 = vpop.xlane.xlu0 %58 }
  0xb2   :  { %v71_v18 = vpop.permute.xlu0 %70 }
  0xb3   :  { %v73_v19 = vsel %vm24_vm0, %v71_v18, 0.0 }
  0xb4   :  { %74 = vst.msk [vmem:[#allocation4] sm:$0x3] %vm45_vm1, %v73_v19 }
 0x100   :  { %v42_v14 = vpop.permute.xlu1 %41 }
 0x101   :  { %v44_v15 = vsel %vm24_vm0, %v42_v14, 0.0 }
 0x102   :  { %v46_v16 = vsel %vm45_vm1, %v44_v15, 0.0 }
 0x103   :  { %47 = vadd.xlane.f32.xlu1 %v46_v16 }
 0x104   :  { %158 = shalt.err (!%p155_p4)
}
 0x105   :  { %98 = dma.vmem_to_hbm [thread:$0]  %s96_s2, 32, %s308_s4, [#allocation5]   ;;  %68 = vst.msk [vmem:[#allocation2] sm:$0x3] %vm45_vm1, %v67_v20 }
 0x106   :  { %s167_s9 = scalar_lea.vmem %s86_s29, 32  ;;  %p172_p6 = scmp.lt.s32.totalorder %s86_s29, %s86_s29 }
 0x107   :  { %p168_p5 = scmp.ne.s32.totalorder %s86_s29, %s167_s9  ;;  %p173_p7 = scmp.lt.s32.totalorder %s167_s9, %s167_s9 }
 0x109   :  { %p174_p8 = por %p173_p7, %p172_p6 }
 0x10b   :  { %p175_p9 = pnand %p174_p8, %p168_p5 }
 0x10d   :  { %178 = shalt.err (!%p175_p9)
}
 0x10e   :  { %88 = dma.vmem_to_hbm [thread:$0]  %s86_s29, 32, %s307_s3, [#allocation3]   ;;  %v60_v21 = vrot.slane %v59_v17, 4 }
 0x10f   :  { %s238_s4 = smov [#allocation6]   ;;  %s239_s13 = smov [#allocation7]  }
 0x110   :  { %v61_v22 = vadd.f32 %v60_v21, %v59_v17  ;;  %s105_s12 = sshll.u32 %s238_s4, 4  ;;  %s115_s14 = sshll.u32 %s239_s13, 4  ;;  %s106_s12 = int_to_ptr.vmem [resolvable:$true] %s105_s12  ;;  %s116_s14 = int_to_ptr.vmem [resolvable:$true] %s115_s14 }
 0x111   :  { %s187_s16 = scalar_lea.vmem %s106_s12, 128  ;;  %p192_p11 = scmp.lt.s32.totalorder %s106_s12, %s106_s12 }
 0x112   :  { %v62_v23 = vrot.slane %v61_v22, 2  ;;  %p188_p10 = scmp.ne.s32.totalorder %s106_s12, %s187_s16  ;;  %p193_p12 = scmp.lt.s32.totalorder %s187_s16, %s187_s16 }
 0x114   :  { %v63_v27 = vadd.f32 %v62_v23, %v61_v22  ;;  %p194_p13 = por %p193_p12, %p192_p11 }
 0x116   :  { %v64_v30 = vrot.slane %v63_v27, 1  ;;  %p195_p0 = pnand %p194_p13, %p188_p10 }
 0x118   :  { %v65_v33 = vadd.f32 %v64_v30, %v63_v27 }
 0x18c   :  { %v48_v24 = vpop.xlane.xlu1 %47 }
 0x18d   :  { %v49_v25 = vrot.slane %v48_v24, 4 }
 0x18f   :  { %v50_v26 = vadd.f32 %v49_v25, %v48_v24 }
 0x191   :  { %v51_v28 = vrot.slane %v50_v26, 2 }
 0x193   :  { %v52_v29 = vadd.f32 %v51_v28, %v50_v26 }
 0x195   :  { %v53_v31 = vrot.slane %v52_v29, 1 }
 0x197   :  { %v54_v32 = vadd.f32 %v53_v31, %v52_v29 }
 0x199   :  { %134 = vpush %v54_v32 }
 0x19a   :  { %136 = vpush %v65_v33 }
 0x1ca   :  { %s135_s3 = spop %134 }
 0x1cb   :  { %v75_v34 = vstv %s135_s3  ;;  %s137_s15 = spop %136 }
 0x1cc   :  { %76 = vst [vmem:[#allocation6] sm:$0xff] %v75_v34  ;;  %v77_v35 = vstv %s137_s15 }
 0x1cd   :  { %78 = vst [vmem:[#allocation7] sm:$0xff] %v77_v35 }
 0x1ce   :  { %198 = shalt.err (!%p195_p0)
}
 0x1cf   :  { %108 = dma.vmem_to_hbm [thread:$0]  %s106_s12, 128, %s309_s5, [#allocation5]  }
 0x1d0   :  { %s207_s19 = scalar_lea.vmem %s116_s14, 128  ;;  %p212_p2 = scmp.lt.s32.totalorder %s116_s14, %s116_s14 }
 0x1d1   :  { %p208_p1 = scmp.ne.s32.totalorder %s116_s14, %s207_s19  ;;  %p213_p3 = scmp.lt.s32.totalorder %s207_s19, %s207_s19 }
 0x1d3   :  { %p214_p4 = por %p213_p3, %p212_p2 }
 0x1d5   :  { %p215_p5 = pnand %p214_p4, %p208_p1 }
 0x1d7   :  { %218 = shalt.err (!%p215_p5)
}
 0x1d8   :  { %118 = dma.vmem_to_hbm [thread:$0]  %s116_s14, 128, %s310_s6, [#allocation8]  }
 0x1d9   :  { %227 = dma.done.wait [#allocation3], 32  }
 0x1da   :  { %228 = vsyncadd [#allocation3], 4294967264 }
 0x1db   :  { %229 = dma.done.wait [#allocation5], 160  }
 0x1dc   :  { %230 = vsyncadd [#allocation5], 4294967136 }
 0x1dd   :  { %231 = dma.done.wait [#allocation8], 128  }
 0x1de   :  { %232 = vsyncadd [#allocation8], 4294967168 }
 0x1df   :  { %131 = vsyncpa [#allocation3], 1 }
 0x1e0   :  { %132 = vsyncpa [#allocation5], 1 }
 0x1e1   :  { %133 = vsyncpa [#allocation8], 1 }

</bundles_post_ra>
